<compile_context>
chip_gen: v6e
topology: v6e:2x2x1
jax: 0.10.0
libtpu: 0.0.40
codegen_flags: <defaults>
</compile_context>

<pallas_src>
import functools

import jax
import jax.numpy as jnp
from jax.experimental import pallas as pl
from jax.experimental.pallas import tpu as pltpu


def _qmlp_kernel(g_ref, p_ref, wg_ref, wp_ref, b_ref, m_ref, o_ref, *,
                 scale, logscale):
    # activation(gnn output); flatten(start_dim=1) is a no-op for elementwise tanh
    g = jnp.tanh(g_ref[...]).astype(jnp.bfloat16)
    p = p_ref[...].astype(jnp.bfloat16)
    # final_linear on cat([graph_flat, player], 1) == split matmul sum (exact)
    val = (jnp.dot(g, wg_ref[...], preferred_element_type=jnp.float32)
           + jnp.dot(p, wp_ref[...], preferred_element_type=jnp.float32)
           + b_ref[...])
    # val[:, :, ~action_mask] = -1e6 (mask applied BEFORE exp/scale, as in torch)
    val = jnp.where(m_ref[...] > 0.5, val, jnp.float32(-1000000.0))
    if logscale:
        val = jnp.exp(val)
    o_ref[...] = val * jnp.float32(scale)


def prepare_qmlp_params(weight, bias, action_mask, n_graph_feats):
    """One-time parameter prep (hoisted out of the per-step forward path).

    weight: (OUT, Fg+Fp) PyTorch nn.Linear layout; bias: (OUT,);
    action_mask: (group,) bool; n_graph_feats: Fg = n_nodes * gnn.out_size.
    """
    OUT, F_in = weight.shape
    Fg = int(n_graph_feats)
    group = int(action_mask.shape[0])
    assert OUT % group == 0
    out_pad = ((OUT + 127) // 128) * 128           # 648 -> 768: lane-dense output
    pad = out_pad - OUT

    w_t = jnp.asarray(weight, jnp.float32).T       # (Fg+Fp, OUT)
    wg = jnp.pad(w_t[:Fg], ((0, 0), (0, pad))).astype(jnp.bfloat16)
    wp = jnp.pad(w_t[Fg:], ((0, 0), (0, pad))).astype(jnp.bfloat16)
    b2 = jnp.pad(jnp.asarray(bias, jnp.float32), (0, pad)).reshape(1, out_pad)
    # mask over the last axis of the (B, n_groups, group) view == tile over groups
    mask_f = jnp.tile(jnp.asarray(action_mask, jnp.float32), OUT // group)
    mask_f = jnp.pad(mask_f, (0, pad)).reshape(1, out_pad)

    return {"wg": wg, "wp": wp, "bias": b2, "mask": mask_f,
            "out": OUT, "out_pad": out_pad, "group": group}


def graphsage_qmlp_forward(graph_pre, player, params, *, scale=1.0,
                           logscale=False, block_b=None):
    """graph_pre: (B, Fg) pre-tanh flattened gnn output; player: (B, Fp)."""
    B, Fg = graph_pre.shape
    _, Fp = player.shape
    OUT, out_pad, group = params["out"], params["out_pad"], params["group"]
    assert params["wg"].shape == (Fg, out_pad)
    assert params["wp"].shape == (Fp, out_pad)

    if block_b is None:
        block_b = B if B <= 512 else 256
    if B % block_b != 0:
        block_b = B            # single batch block for ragged batch sizes

    grid = (B // block_b,)
    kernel = functools.partial(_qmlp_kernel, scale=float(scale),
                               logscale=bool(logscale))

    out = pl.pallas_call(
        kernel,
        out_shape=jax.ShapeDtypeStruct((B, out_pad), jnp.float32),
        grid=grid,
        in_specs=[
            pl.BlockSpec((block_b, Fg), lambda i: (i, 0)),   # activations: tile over B
            pl.BlockSpec((block_b, Fp), lambda i: (i, 0)),
            pl.BlockSpec((Fg, out_pad), lambda i: (0, 0)),   # weights stay resident
            pl.BlockSpec((Fp, out_pad), lambda i: (0, 0)),
            pl.BlockSpec((1, out_pad), lambda i: (0, 0)),    # bias
            pl.BlockSpec((1, out_pad), lambda i: (0, 0)),    # tiled action mask
        ],
        out_specs=pl.BlockSpec((block_b, out_pad), lambda i: (i, 0)),
        compiler_params=pltpu.CompilerParams(
            dimension_semantics=("parallel",)),
    )(graph_pre.astype(jnp.float32), player.astype(jnp.float32),
      params["wg"], params["wp"], params["bias"], params["mask"])

    return out[:, :OUT].reshape(B, OUT // group, group)


if __name__ == "__main__":
    key = jax.random.PRNGKey(0)
    B = 2
    N_NODES, OUT_SIZE = 54, 8           # gnn.structure.shape[0], gnn.out_size
    EXTRA = 10                          # env.graph_observation_space['total']
    OUT = 4 * 54 * 3                    # 648
    Fg = N_NODES * OUT_SIZE             # 432

    k1, k2, k3, k4 = jax.random.split(key, 4)
    # TODO(synk): the gnn submodule's source is not provided; its forward output
    # is modeled as a synthetic (B, N*out_size) pre-activation tensor here.
    graph_pre = jax.random.normal(k1, (B, Fg), dtype=jnp.float32)
    player = jax.random.normal(k2, (B, EXTRA), dtype=jnp.float32)
    weight = jax.random.normal(k3, (OUT, Fg + EXTRA), dtype=jnp.float32) * 0.02
    bias = jax.random.normal(k4, (OUT,), dtype=jnp.float32) * 0.02
    # deterministic synthetic env action mask (162 entries)
    action_mask = (jnp.arange(54 * 3) % 3) != 2

    # one-time prep (done at module init in a real deployment)
    params = prepare_qmlp_params(weight, bias, action_mask, Fg)

    # pure-JAX f32 reference of the torch forward
    mlp_in = jnp.concatenate([jnp.tanh(graph_pre), player], axis=1)
    raw = (mlp_in @ weight.T + bias).reshape(B, 4, 162)
    raw = jnp.where(action_mask[None, None, :], raw, -1000000.0)

    # (1) plain scaling path
    val = graphsage_qmlp_forward(graph_pre, player, params,
                                 scale=1.0, logscale=False)
    jax.block_until_ready(val)
    assert val.shape == (B, 4, 162)
    assert jnp.allclose(val, raw * 1.0, atol=2e-2, rtol=2e-2)

    # (2) logscale path: mask -> exp -> scale (matches the torch ordering,
    #     i.e. masked entries become exp(-1e6) * scale == 0.0)
    val_log = graphsage_qmlp_forward(graph_pre, player, params,
                                     scale=0.5, logscale=True)
    jax.block_until_ready(val_log)
    ref_log = jnp.exp(raw) * 0.5
    assert jnp.allclose(val_log, ref_log, atol=2e-2, rtol=2e-2)

    print("KERNEL_OK")
</pallas_src>

<mosaic_0001>
module attributes {stable_mosaic.version = 11 : i64} {
  func.func @_qmlp_kernel(%arg0: i32, %arg1: memref<2x432xf32, #tpu.memory_space<vmem>>, %arg2: memref<2x10xf32, #tpu.memory_space<vmem>>, %arg3: memref<432x768xbf16, #tpu.memory_space<vmem>>, %arg4: memref<10x768xbf16, #tpu.memory_space<vmem>>, %arg5: memref<1x768xf32, #tpu.memory_space<vmem>>, %arg6: memref<1x768xf32, #tpu.memory_space<vmem>>, %arg7: memref<2x768xf32, #tpu.memory_space<vmem>>) attributes {dimension_semantics = [#tpu.dimension_semantics<parallel>], iteration_bounds = array<i64: 1>, scalar_prefetch = 0 : i64, scratch_operands = 0 : i64, tpu.core_type = #tpu.core_type<tc>, window_params = [{transform_indices = @transform_0, window_bounds = array<i64: 2, 432>}, {transform_indices = @transform_1, window_bounds = array<i64: 2, 10>}, {pipeline_mode = #tpu.pipeline_mode<synchronous>, transform_indices = @transform_2, window_bounds = array<i64: 432, 768>}, {pipeline_mode = #tpu.pipeline_mode<synchronous>, transform_indices = @transform_3, window_bounds = array<i64: 10, 768>}, {pipeline_mode = #tpu.pipeline_mode<synchronous>, transform_indices = @transform_4, window_bounds = array<i64: 1, 768>}, {pipeline_mode = #tpu.pipeline_mode<synchronous>, transform_indices = @transform_5, window_bounds = array<i64: 1, 768>}, {transform_indices = @transform_6, window_bounds = array<i64: 2, 768>}]} {
    %c0 = arith.constant 0 : index
    %c0_0 = arith.constant 0 : index
    %0 = vector.load %arg1[%c0, %c0_0] : memref<2x432xf32, #tpu.memory_space<vmem>>, vector<2x432xf32>
    %1 = math.tanh %0 : vector<2x432xf32>
    %2 = arith.truncf %1 : vector<2x432xf32> to vector<2x432xbf16>
    %c0_1 = arith.constant 0 : index
    %c0_2 = arith.constant 0 : index
    %3 = vector.load %arg2[%c0_1, %c0_2] : memref<2x10xf32, #tpu.memory_space<vmem>>, vector<2x10xf32>
    %4 = arith.truncf %3 : vector<2x10xf32> to vector<2x10xbf16>
    %c0_3 = arith.constant 0 : index
    %c0_4 = arith.constant 0 : index
    %5 = vector.load %arg3[%c0_3, %c0_4] : memref<432x768xbf16, #tpu.memory_space<vmem>>, vector<432x768xbf16>
    %cst = arith.constant dense<0.000000e+00> : vector<2x768xf32>
    %6 = tpu.matmul %2, %5, %cst {dimension_numbers = #tpu.dot_dimension_numbers<[1], [0], [0], [1], [0, 0, 1, 1], [], []>} : vector<2x432xbf16>, vector<432x768xbf16>, vector<2x768xf32> -> vector<2x768xf32>
    %c0_5 = arith.constant 0 : index
    %c0_6 = arith.constant 0 : index
    %7 = vector.load %arg4[%c0_5, %c0_6] : memref<10x768xbf16, #tpu.memory_space<vmem>>, vector<10x768xbf16>
    %cst_7 = arith.constant dense<0.000000e+00> : vector<2x768xf32>
    %8 = tpu.matmul %4, %7, %cst_7 {dimension_numbers = #tpu.dot_dimension_numbers<[1], [0], [0], [1], [0, 0, 1, 1], [], []>} : vector<2x10xbf16>, vector<10x768xbf16>, vector<2x768xf32> -> vector<2x768xf32>
    %9 = arith.addf %6, %8 : vector<2x768xf32>
    %c0_8 = arith.constant 0 : index
    %c0_9 = arith.constant 0 : index
    %10 = vector.load %arg5[%c0_8, %c0_9] : memref<1x768xf32, #tpu.memory_space<vmem>>, vector<1x768xf32>
    %11 = vector.broadcast %10 : vector<1x768xf32> to vector<2x768xf32>
    %12 = arith.addf %9, %11 : vector<2x768xf32>
    %c0_10 = arith.constant 0 : index
    %c0_11 = arith.constant 0 : index
    %13 = vector.load %arg6[%c0_10, %c0_11] : memref<1x768xf32, #tpu.memory_space<vmem>>, vector<1x768xf32>
    %cst_12 = arith.constant 5.000000e-01 : f32
    %14 = vector.broadcast %cst_12 : f32 to vector<1x768xf32>
    %15 = arith.cmpf ogt, %13, %14 : vector<1x768xf32>
    %cst_13 = arith.constant -1.000000e+06 : f32
    %16 = vector.shape_cast %15 : vector<1x768xi1> to vector<1x768xi1>
    %17 = vector.broadcast %16 : vector<1x768xi1> to vector<2x768xi1>
    %18 = vector.broadcast %cst_13 : f32 to vector<2x768xf32>
    %19 = arith.select %17, %12, %18 : vector<2x768xi1>, vector<2x768xf32>
    %cst_14 = arith.constant 1.000000e+00 : f32
    %20 = vector.broadcast %cst_14 : f32 to vector<2x768xf32>
    %21 = arith.mulf %19, %20 : vector<2x768xf32>
    %c0_15 = arith.constant 0 : index
    %c0_16 = arith.constant 0 : index
    %22 = vector.load %arg7[%c0_15, %c0_16] : memref<2x768xf32, #tpu.memory_space<vmem>>, vector<2x768xf32>
    tpu.vector_store %arg7[%c0_15, %c0_16], %21 {strides = array<i32>} : memref<2x768xf32, #tpu.memory_space<vmem>>, vector<2x768xf32>,
    return
  }
  func.func @transform_0(%arg0: i32) -> (i32, i32) {
    %c0_i32 = arith.constant 0 : i32
    %c0_i32_0 = arith.constant 0 : i32
    return %arg0, %c0_i32 : i32, i32
  }
  func.func @transform_1(%arg0: i32) -> (i32, i32) {
    %c0_i32 = arith.constant 0 : i32
    %c0_i32_0 = arith.constant 0 : i32
    return %arg0, %c0_i32 : i32, i32
  }
  func.func @transform_2(%arg0: i32) -> (i32, i32) {
    %c0_i32 = arith.constant 0 : i32
    %c0_i32_0 = arith.constant 0 : i32
    %c0_i32_1 = arith.constant 0 : i32
    return %c0_i32, %c0_i32_0 : i32, i32
  }
  func.func @transform_3(%arg0: i32) -> (i32, i32) {
    %c0_i32 = arith.constant 0 : i32
    %c0_i32_0 = arith.constant 0 : i32
    %c0_i32_1 = arith.constant 0 : i32
    return %c0_i32, %c0_i32_0 : i32, i32
  }
  func.func @transform_4(%arg0: i32) -> (i32, i32) {
    %c0_i32 = arith.constant 0 : i32
    %c0_i32_0 = arith.constant 0 : i32
    %c0_i32_1 = arith.constant 0 : i32
    return %c0_i32, %c0_i32_0 : i32, i32
  }
  func.func @transform_5(%arg0: i32) -> (i32, i32) {
    %c0_i32 = arith.constant 0 : i32
    %c0_i32_0 = arith.constant 0 : i32
    %c0_i32_1 = arith.constant 0 : i32
    return %c0_i32, %c0_i32_0 : i32, i32
  }
  func.func @transform_6(%arg0: i32) -> (i32, i32) {
    %c0_i32 = arith.constant 0 : i32
    %c0_i32_0 = arith.constant 0 : i32
    return %arg0, %c0_i32 : i32, i32
  }
}

</mosaic_0001>

<bundles_post_ra>
// kernel: tpu_custom_call.1
= control target key start
LH: loop header
LB: loop body
LE: loop exit
PB: predicated region body
PF: predicated region fallthrough
CT: control target
= control target key end

     0   :  { %11 = vsyncpa [#allocation3], 0  ;;  %s2353_s0 = inlined_call_operand.hbm [shape: f32[2,432], index: 0, kind: input, shape index: {}]   ;;  %s2354_s1 = inlined_call_operand.hbm [shape: f32[2,10], index: 1, kind: input, shape index: {}]   ;;  %s2355_s2 = inlined_call_operand.hbm [shape: bf16[432,768], index: 2, kind: input, shape index: {}]   ;;  %s2356_s3 = inlined_call_operand.hbm [shape: bf16[10,768], index: 3, kind: input, shape index: {}]   ;;  %s2357_s4 = inlined_call_operand.vmem [shape: f32[1,768], index: 4, kind: input, shape index: {}]   ;;  %s2358_s5 = inlined_call_operand.hbm [shape: f32[1,768], index: 5, kind: input, shape index: {}]   ;;  %s2359_s6 = inlined_call_operand.hbm [shape: f32[2,768], index: 6, kind: output, shape index: {}]  }
   0x1   :  { %12 = vsyncpa [#allocation6], 0 }
   0x2   :  { %13 = vsyncpa [#allocation9], 0 }
   0x3   :  { %14 = vsyncpa [#allocation4], 0  ;;  %s2214_s21 = smov [#allocation5]  }
   0x4   :  { %s31_s22 = sshll.u32 %s2214_s21, 4  ;;  %s32_s22 = int_to_ptr.vmem [resolvable:$true] %s31_s22 }
   0x5   :  { %s2094_s23 = scalar_lea.vmem %s32_s22, 32  ;;  %p2099_p1 = scmp.lt.s32.totalorder %s32_s22, %s32_s22 }
   0x6   :  { %p2095_p0 = scmp.ne.s32.totalorder %s32_s22, %s2094_s23  ;;  %p2100_p2 = scmp.lt.s32.totalorder %s2094_s23, %s2094_s23 }
   0x8   :  { %p2101_p3 = por %p2100_p2, %p2099_p1 }
   0xa   :  { %p2102_p4 = pnand %p2101_p3, %p2095_p0 }
   0xc   :  { %2105 = shalt.err (!%p2102_p4)
}
   0xd   :  { %34 = dma.hbm_to_vmem [thread:$0]  %s2354_s1, 32, %s32_s22, [#allocation6]  }
   0xe   :  { %s2215_s26 = smov [#allocation8]   ;;  %s2216_s28 = smov [#allocation2]  }
   0xf   :  { %s52_s27 = sshll.u32 %s2215_s26, 4  ;;  %s21_s29 = sshll.u32 %s2216_s28, 4  ;;  %s53_s27 = int_to_ptr.vmem [resolvable:$true] %s52_s27  ;;  %s22_s29 = int_to_ptr.vmem [resolvable:$true] %s21_s29 }
  0x10   :  { %s2114_s30 = scalar_lea.vmem %s53_s27, 768  ;;  %p2119_p6 = scmp.lt.s32.totalorder %s53_s27, %s53_s27 }
  0x11   :  { %p2115_p5 = scmp.ne.s32.totalorder %s53_s27, %s2114_s30  ;;  %p2120_p7 = scmp.lt.s32.totalorder %s2114_s30, %s2114_s30 }
  0x13   :  { %p2121_p8 = por %p2120_p7, %p2119_p6 }
  0x15   :  { %p2122_p9 = pnand %p2121_p8, %p2115_p5 }
  0x17   :  { %2125 = shalt.err (!%p2122_p9)
}
  0x18   :  { %s2217_s7 = smov 384   ;;  %s2218_s8 = smov 24  }
  0x19   :  { %58 = dma.hbm_to_vmem [thread:$0]  %s2356_s3, 768, %s53_s27, [#allocation9], %s2217_s7, %s2217_s7, %s2218_s8  }
  0x1a   :  { %s2134_s1 = scalar_lea.vmem %s22_s29, 128  ;;  %p2139_p11 = scmp.lt.s32.totalorder %s22_s29, %s22_s29 }
  0x1b   :  { %p2135_p10 = scmp.ne.s32.totalorder %s22_s29, %s2134_s1  ;;  %p2140_p12 = scmp.lt.s32.totalorder %s2134_s1, %s2134_s1 }
  0x1d   :  { %p2141_p13 = por %p2140_p12, %p2139_p11 }
  0x1f   :  { %p2142_p0 = pnand %p2141_p13, %p2135_p10 }
  0x21   :  { %2145 = shalt.err (!%p2142_p0)
}
  0x22   :  { %24 = dma.hbm_to_vmem [thread:$0]  %s2353_s0, 128, %s22_s29, [#allocation3]  }
  0x23   :  { %s2219_s13 = smov [#allocation7]   ;;  %s2220_s15 = smov [#allocation10]  }
  0x24   :  { %s40_s14 = sshll.u32 %s2219_s13, 4  ;;  %s67_s16 = sshll.u32 %s2220_s15, 4  ;;  %s41_s14 = int_to_ptr.vmem [resolvable:$true] %s40_s14  ;;  %s68_s16 = int_to_ptr.vmem [resolvable:$true] %s67_s16 }
  0x25   :  { %s2154_s17 = scalar_lea.vmem %s41_s14, 20736  ;;  %p2159_p2 = scmp.lt.s32.totalorder %s41_s14, %s41_s14 }
  0x26   :  { %p2155_p1 = scmp.ne.s32.totalorder %s41_s14, %s2154_s17  ;;  %p2160_p3 = scmp.lt.s32.totalorder %s2154_s17, %s2154_s17 }
  0x28   :  { %p2161_p4 = por %p2160_p3, %p2159_p2 }
  0x2a   :  { %p2162_p5 = pnand %p2161_p4, %p2155_p1 }
  0x2c   :  { %2165 = shalt.err (!%p2162_p5)
}
  0x2d   :  { %46 = dma.hbm_to_vmem [thread:$0]  %s2355_s2, 20736, %s41_s14, [#allocation6], %s2217_s7, %s2217_s7, %s2218_s8  }
  0x2e   :  { %s2174_s19 = scalar_lea.vmem %s68_s16, 96  ;;  %p2179_p7 = scmp.lt.s32.totalorder %s68_s16, %s68_s16 }
  0x2f   :  { %p2175_p6 = scmp.ne.s32.totalorder %s68_s16, %s2174_s19  ;;  %p2180_p8 = scmp.lt.s32.totalorder %s2174_s19, %s2174_s19 }
  0x31   :  { %p2181_p9 = por %p2180_p8, %p2179_p7 }
  0x33   :  { %p2182_p10 = pnand %p2181_p9, %p2175_p6 }
  0x35   :  { %2185 = shalt.err (!%p2182_p10)
}
  0x36   :  { %70 = dma.hbm_to_vmem [thread:$0]  %s2358_s5, 96, %s68_s16, [#allocation9]  }
  0x37   :  { %2206 = dma.done.wait [#allocation3], 128  }
  0x38   :  { %2207 = vsyncadd [#allocation3], 4294967168 }
  0x39   :  { %2208 = dma.done.wait [#allocation6], 20768  }
  0x3a   :  { %2209 = vsyncadd [#allocation6], 4294946528 }
  0x3b   :  { %2210 = dma.done.wait [#allocation9], 864  }
  0x3c   :  { %2211 = vsyncadd [#allocation9], 4294966432  ;;  %v2221_v0 = vmov 0   ;;  %vm313_vm0 = vcmask 1044480   ;;  %v1834_v2 = vld [vmem:[#allocation7 + $0x154] ss:$24 sps:$4 sm:$0xff]   ;;  %v94_v52 = vlaneseq }
  0x3d   :  { %364 = vmatprep.mubr.bf16.mxu0 %v2221_v0  ;;  %v1832_v1 = vld [vmem:[#allocation8 + $0x4] ss:$24 sps:$4 sm:$0x1f]   ;;  %v1836_v3 = vld [vmem:[#allocation8] ss:$24 sps:$4 sm:$0x1f]   ;;  %1269 = vmatprep.subr.bf16.mxu1 %v1834_v2 }
  0x3e   :  { %1650 = vmatprep.subr.msk.bf16.mxu0 %vm313_vm0, %v1832_v1  ;;  %v1837_v4 = vld [vmem:[#allocation7 + $0x150] ss:$24 sps:$4 sm:$0xff]   ;;  %v115_v5 = vld [vmem:[#allocation5] sm:$0x3]  ;;  %v315_v6 = vsel %vm313_vm0, %v1836_v3, 0  ;;  %vm309_vm1 = vcmask 80896  }
  0x3f   :  { %1270 = vmatpush1.bf16.msra.mxu1 %v1837_v4  ;;  %v116_v7 = vpack.c.bf16 %v115_v5, %v115_v5  ;;  %v1838_v8 = vld [vmem:[#allocation7 + $0x124] ss:$24 sps:$4 sm:$0xff]   ;;  %v1840_v9 = vld [vmem:[#allocation7 + $0x120] ss:$24 sps:$4 sm:$0xff]   ;;  %347 = vmatpush1.bf16.msra.mxu0 %v315_v6  ;;  %v1844_v12 = vld [vmem:[#allocation7 + $0xf4] ss:$24 sps:$4 sm:$0xff]  }
  0x40   :  { %1271 = vmatprep.subr.bf16.mxu1 %v1838_v8  ;;  %v1841_v10 = vld [vmem:[#allocation8 + $0xc] ss:$24 sps:$4 sm:$0x1f]   ;;  %v1843_v11 = vld [vmem:[#allocation8 + $0x8] ss:$24 sps:$4 sm:$0x1f]  }
  0x41   :  { %v321_v13 = vsel %vm313_vm0, %v1843_v11, 0  ;;  %v1846_v14 = vld [vmem:[#allocation7 + $0xf0] ss:$24 sps:$4 sm:$0xff]   ;;  %1652 = vmatprep.subr.msk.bf16.mxu0 %vm313_vm0, %v1841_v10  ;;  %v1847_v15 = vld [vmem:[#allocation7 + $0xc4] ss:$24 sps:$4 sm:$0xff]   ;;  %v2286_v58 = vshrl.u32 %v94_v52, 7 }
  0x42   :  { %1651 = vmatmul.mubr.msk.bf16.vlgmr.msra.gmra.mxu0 %vm309_vm1, %v116_v7  ;;  %v1850_v16 = vld [vmem:[#allocation8 + $0x14] ss:$24 sps:$4 sm:$0x1f]   ;;  %v1852_v17 = vld [vmem:[#allocation8 + $0x10] ss:$24 sps:$4 sm:$0x1f]  }
  0x43   :  { %1272 = vmatpush1.bf16.msra.mxu1 %v1840_v9  ;;  %388 = vmatpush1.bf16.msra.mxu0 %v321_v13  ;;  %v1849_v18 = vld [vmem:[#allocation7 + $0xc0] ss:$24 sps:$4 sm:$0xff]   ;;  %v1853_v19 = vld [vmem:[#allocation7 + $0x94] ss:$24 sps:$4 sm:$0xff]   ;;  %v327_v20 = vsel %vm313_vm0, %v1852_v17, 0  ;;  %vm1265_vm2 = vcmask 392192  }
  0x44   :  { %1273 = vmatprep.subr.bf16.mxu1 %v1844_v12  ;;  %405 = vmatprep.mubr.bf16.mxu0 %v2221_v0  ;;  %v1858_v21 = vld [vmem:[#allocation7 + $0x454] ss:$24 sps:$4 sm:$0xff]   ;;  %v1855_v22 = vld [vmem:[#allocation7 + $0x90] ss:$24 sps:$4 sm:$0xff]   ;;  %v1859_v23 = vld [vmem:[#allocation7 + $0x64] ss:$24 sps:$4 sm:$0xff]  }
  0x45   :  { %1654 = vmatprep.subr.msk.bf16.mxu0 %vm313_vm0, %v1850_v16  ;;  %v1861_v24 = vld [vmem:[#allocation7 + $0x60] ss:$24 sps:$4 sm:$0xff]   ;;  %v1856_v25 = vld [vmem:[#allocation7 + $0x450] ss:$24 sps:$4 sm:$0xff]   ;;  %v1865_v26 = vld [vmem:[#allocation7 + $0x34] ss:$24 sps:$4 sm:$0xff]  }
  0x46   :  { %v1864_v27 = vld [vmem:[#allocation7 + $0x424] ss:$24 sps:$4 sm:$0xff]   ;;  %v1867_v28 = vld [vmem:[#allocation7 + $0x30] ss:$24 sps:$4 sm:$0xff]   ;;  %v1862_v29 = vld [vmem:[#allocation7 + $0x420] ss:$24 sps:$4 sm:$0xff]  }
  0x47   :  { %1274 = vmatpush1.bf16.msra.mxu1 %v1846_v14  ;;  %v1871_v30 = vld [vmem:[#allocation7 + $0x4] ss:$24 sps:$4 sm:$0xff]   ;;  %v1870_v31 = vld [vmem:[#allocation7 + $0x3f4] ss:$24 sps:$4 sm:$0xff]   ;;  %v1873_v32 = vld [vmem:[#allocation7] ss:$24 sps:$4 sm:$0xff]  }
  0x48   :  { %1275 = vmatprep.subr.bf16.mxu1 %v1847_v15  ;;  %v1868_v33 = vld [vmem:[#allocation7 + $0x3f0] ss:$24 sps:$4 sm:$0xff]   ;;  %v1877_v34 = vld [vmem:[#allocation7 + $0x2d4] ss:$24 sps:$4 sm:$0xff]   ;;  %v1876_v35 = vld [vmem:[#allocation7 + $0x3c4] ss:$24 sps:$4 sm:$0xff]  }
  0x49   :  { %v1879_v36 = vld [vmem:[#allocation7 + $0x2d0] ss:$24 sps:$4 sm:$0xff]   ;;  %v1874_v37 = vld [vmem:[#allocation7 + $0x3c0] ss:$24 sps:$4 sm:$0xff]   ;;  %v1883_v38 = vld [vmem:[#allocation7 + $0x2a4] ss:$24 sps:$4 sm:$0xff]  }
  0x4a   :  { %1653 = vmatmul.mubr.msk.bf16.vlgmr.msra.gmra.mxu0 %vm309_vm1, %v116_v7  ;;  %v1882_v39 = vld [vmem:[#allocation7 + $0x394] ss:$24 sps:$4 sm:$0xff]   ;;  %v1885_v40 = vld [vmem:[#allocation7 + $0x2a0] ss:$24 sps:$4 sm:$0xff]   ;;  %v1880_v41 = vld [vmem:[#allocation7 + $0x390] ss:$24 sps:$4 sm:$0xff]  }
  0x4b   :  { %1276 = vmatpush1.bf16.msra.mxu1 %v1849_v18  ;;  %429 = vmatpush1.bf16.msra.mxu0 %v327_v20  ;;  %v1889_v42 = vld [vmem:[#allocation7 + $0x274] ss:$24 sps:$4 sm:$0xff]   ;;  %v1888_v43 = vld [vmem:[#allocation7 + $0x364] ss:$24 sps:$4 sm:$0xff]   ;;  %v1891_v44 = vld [vmem:[#allocation7 + $0x270] ss:$24 sps:$4 sm:$0xff]  }
  0x4c   :  { %1277 = vmatprep.subr.bf16.mxu1 %v1853_v19  ;;  %446 = vmatprep.mubr.bf16.mxu0 %v2221_v0  ;;  %v1886_v45 = vld [vmem:[#allocation7 + $0x360] ss:$24 sps:$4 sm:$0xff]   ;;  %v1895_v46 = vld [vmem:[#allocation7 + $0x244] ss:$24 sps:$4 sm:$0xff]   ;;  %v1894_v48 = vld [vmem:[#allocation7 + $0x334] ss:$24 sps:$4 sm:$0xff]  }
  0x4d   :  { %1310 = vmatprep.subr.bf16.mxu0 %v1858_v21  ;;  %v87_v47 = vld [vmem:[#allocation2] sm:$0xff]  ;;  %v2222_v50 = vmov 1983009808   ;;  %v1892_v53 = vld [vmem:[#allocation7 + $0x330] ss:$24 sps:$4 sm:$0xff]  }
  0x4e   :  { %2084 = vtanh.f32 %v87_v47  ;;  %v1897_v49 = vld [vmem:[#allocation7 + $0x240] ss:$24 sps:$4 sm:$0xff]   ;;  %v92_v51 = vunpack.c.l.s4 %v2222_v50  ;;  %v1901_v54 = vld [vmem:[#allocation7 + $0x214] ss:$24 sps:$4 sm:$0xff]   ;;  %v1900_v55 = vld [vmem:[#allocation7 + $0x304] ss:$24 sps:$4 sm:$0xff]  }
  0x4f   :  { %1278 = vmatpush1.bf16.msra.mxu1 %v1855_v22  ;;  %v1903_v56 = vld [vmem:[#allocation7 + $0x210] ss:$24 sps:$4 sm:$0xff]   ;;  %v1898_v59 = vld [vmem:[#allocation7 + $0x300] ss:$24 sps:$4 sm:$0xff]   ;;  %v1907_v60 = vld [vmem:[#allocation7 + $0x1e4] ss:$24 sps:$4 sm:$0xff]  }
  0x50   :  { %1279 = vmatprep.subr.bf16.mxu1 %v1859_v23  ;;  %v93_v57 = vunpack.c.0.s8 %v92_v51  ;;  %v1906_v61 = vld [vmem:[#allocation7 + $0x4e4] ss:$24 sps:$4 sm:$0xff]   ;;  %v1909_v62 = vld [vmem:[#allocation7 + $0x1e0] ss:$24 sps:$4 sm:$0xff]   ;;  %v1913_v2 = vld [vmem:[#allocation7 + $0x1b4] ss:$24 sps:$4 sm:$0xff]  }
  0x51   :  { %v1904_v1 = vld [vmem:[#allocation7 + $0x4e0] ss:$24 sps:$4 sm:$0xff]   ;;  %v1912_v3 = vld [vmem:[#allocation7 + $0x4b4] ss:$24 sps:$4 sm:$0xff]   ;;  %v1915_v5 = vld [vmem:[#allocation7 + $0x1b0] ss:$24 sps:$4 sm:$0xff]  }
  0x52   :  { %1655 = vmatmul.mubr.msk.bf16.vlgmr.msra.gmra.mxu0 %vm309_vm1, %v116_v7  ;;  %v2289_v63 = vsub.s32 %v93_v57, %v2286_v58  ;;  %v1910_v8 = vld [vmem:[#allocation7 + $0x4b0] ss:$24 sps:$4 sm:$0xff]   ;;  %v1919_v9 = vld [vmem:[#allocation7 + $0x184] ss:$24 sps:$4 sm:$0xff]   ;;  %v1921_v13 = vld [vmem:[#allocation7 + $0x180] ss:$24 sps:$4 sm:$0xff]  }
  0x53   :  { %1280 = vmatpush1.bf16.msra.mxu1 %v1861_v24  ;;  %1311 = vmatpush1.bf16.msra.mxu0 %v1856_v25  ;;  %v1918_v10 = vld [vmem:[#allocation7 + $0x484] ss:$24 sps:$4 sm:$0xff]   ;;  %v1916_v16 = vld [vmem:[#allocation7 + $0x480] ss:$24 sps:$4 sm:$0xff]  }
  0x54   :  { %1281 = vmatprep.subr.bf16.mxu1 %v1865_v26  ;;  %1312 = vmatprep.subr.bf16.mxu0 %v1864_v27  ;;  %v1927_v17 = vld [vmem:[#allocation7 + $0x45c] ss:$24 sps:$4 sm:$0xff]   ;;  %v1925_v22 = vld [vmem:[#allocation7 + $0x458] ss:$24 sps:$4 sm:$0xff]   ;;  %v1933_v24 = vld [vmem:[#allocation7 + $0x42c] ss:$24 sps:$4 sm:$0xff]  }
  0x55   :  { %v1924_v19 = vld [vmem:[#allocation7 + $0x15c] ss:$24 sps:$4 sm:$0xff]   ;;  %v1922_v23 = vld [vmem:[#allocation7 + $0x158] ss:$24 sps:$4 sm:$0xff]   ;;  %v1930_v25 = vld [vmem:[#allocation7 + $0x12c] ss:$24 sps:$4 sm:$0xff]  }
  0x56   :  { %v1931_v26 = vld [vmem:[#allocation7 + $0x428] ss:$24 sps:$4 sm:$0xff]   ;;  %v1958_v47 = vld [vmem:[#allocation7 + $0x38] ss:$24 sps:$4 sm:$0xff]   ;;  %v1975_v52 = vld [vmem:[#allocation7 + $0x4ec] ss:$24 sps:$4 sm:$0xff]  }
  0x57   :  { %1282 = vmatpush1.bf16.msra.mxu1 %v1867_v28  ;;  %1313 = vmatpush1.bf16.msra.mxu0 %v1862_v29  ;;  %v1928_v27 = vld [vmem:[#allocation7 + $0x128] ss:$24 sps:$4 sm:$0xff]   ;;  %v1939_v28 = vld [vmem:[#allocation7 + $0x3fc] ss:$24 sps:$4 sm:$0xff]   ;;  %v1978_v57 = vld [vmem:[#allocation7 + $0x2ac] ss:$24 sps:$4 sm:$0xff]  }
  0x58   :  { %1283 = vmatprep.subr.bf16.mxu1 %v1871_v30  ;;  %1314 = vmatprep.subr.bf16.mxu0 %v1870_v31  ;;  %v1936_v29 = vld [vmem:[#allocation7 + $0xfc] ss:$24 sps:$4 sm:$0xff]   ;;  %v1937_v30 = vld [vmem:[#allocation7 + $0x3f8] ss:$24 sps:$4 sm:$0xff]   ;;  %v1967_v50 = vld [vmem:[#allocation7 + $0x308] ss:$24 sps:$4 sm:$0xff]  }
  0x59   :  { %v1934_v31 = vld [vmem:[#allocation7 + $0xf8] ss:$24 sps:$4 sm:$0xff]   ;;  %v1964_v51 = vld [vmem:[#allocation7 + $0x8] ss:$24 sps:$4 sm:$0xff]  }
  0x5b   :  { %1284 = vmatpush1.bf16.msra.mxu1 %v1873_v32  ;;  %1315 = vmatpush1.bf16.msra.mxu0 %v1868_v33  ;;  %v2085_v4 = vpop.eup %2084  ;;  %v1945_v32 = vld [vmem:[#allocation7 + $0x3cc] ss:$24 sps:$4 sm:$0xff]  }
  0x5c   :  { %1285 = vmatprep.subr.bf16.mxu1 %v1877_v34  ;;  %1316 = vmatprep.subr.bf16.mxu0 %v1876_v35  ;;  %v90_v6 = vcombine.high %v2085_v4, %v2085_v4  ;;  %v97_v7 = vrot.slane %v2085_v4, %v2289_v63  ;;  %v1942_v33 = vld [vmem:[#allocation7 + $0xcc] ss:$24 sps:$4 sm:$0xff]   ;;  %v1943_v34 = vld [vmem:[#allocation7 + $0x3c8] ss:$24 sps:$4 sm:$0xff]  }
  0x5d   :  { %v1940_v35 = vld [vmem:[#allocation7 + $0xc8] ss:$24 sps:$4 sm:$0xff]   ;;  %v1990_v4 = vld [vmem:[#allocation7 + $0x24c] ss:$24 sps:$4 sm:$0xff]  }
  0x5e   :  { %v104_v11 = vrot.slane %v90_v6, %v2289_v63  ;;  %v105_v12 = vcombine.high %v97_v7, %v97_v7  ;;  %v2298_v20 = vpack.c.bf16 %v97_v7, %v97_v7  ;;  %v1988_v6 = vld [vmem:[#allocation7 + $0x248] ss:$24 sps:$4 sm:$0xff]   ;;  %v1999_v7 = vld [vmem:[#allocation7 + $0x134] ss:$24 sps:$4 sm:$0xff]  }
  0x5f   :  { %1286 = vmatpush2.bf16.msra.mxu1 %v1879_v36  ;;  %1317 = vmatpush1.bf16.msra.mxu0 %v1874_v37  ;;  %v1951_v36 = vld [vmem:[#allocation7 + $0x39c] ss:$24 sps:$4 sm:$0xff]  }
  0x60   :  { %1287 = vmatprep.subr.bf16.mxu1 %v1883_v38  ;;  %1318 = vmatprep.subr.bf16.mxu0 %v1882_v39  ;;  %v106_v14 = vcombine.high %v104_v11, %v104_v11  ;;  %v2293_v15 = vpack.c.bf16 %v105_v12, %v105_v12  ;;  %v2302_v21 = vpack.c.bf16 %v104_v11, %v104_v11  ;;  %v1948_v37 = vld [vmem:[#allocation7 + $0x9c] ss:$24 sps:$4 sm:$0xff]   ;;  %v1949_v38 = vld [vmem:[#allocation7 + $0x398] ss:$24 sps:$4 sm:$0xff]   ;;  %v2002_v12 = vld [vmem:[#allocation7 + $0x1ec] ss:$24 sps:$4 sm:$0xff]  }
  0x61   :  { %v1946_v39 = vld [vmem:[#allocation7 + $0x98] ss:$24 sps:$4 sm:$0xff]   ;;  %v2005_v11 = vld [vmem:[#allocation7 + $0x104] ss:$24 sps:$4 sm:$0xff]  }
  0x62   :  { %v2295_v18 = vpack.c.bf16 %v106_v14, %v106_v14  ;;  %1301 = vmatprep.mubr.bf16.mxu1 %v2293_v15  ;;  %v2000_v14 = vld [vmem:[#allocation7 + $0x1e8] ss:$24 sps:$4 sm:$0xff]  }
  0x63   :  { %1288 = vmatpush2.bf16.msra.mxu1 %v1885_v40  ;;  %1319 = vmatpush1.bf16.msra.mxu0 %v1880_v41  ;;  %v1957_v40 = vld [vmem:[#allocation7 + $0x36c] ss:$24 sps:$4 sm:$0xff]  }
  0x64   :  { %1289 = vmatprep.subr.bf16.mxu1 %v1889_v42  ;;  %1320 = vmatprep.subr.bf16.mxu0 %v1888_v43  ;;  %v1954_v41 = vld [vmem:[#allocation7 + $0x6c] ss:$24 sps:$4 sm:$0xff]   ;;  %v1955_v42 = vld [vmem:[#allocation7 + $0x368] ss:$24 sps:$4 sm:$0xff]  }
  0x65   :  { %1818 = vmatprep.mubr.msk.bf16.mxu0 %vm1265_vm2, %v2295_v18  ;;  %v1952_v43 = vld [vmem:[#allocation7 + $0x68] ss:$24 sps:$4 sm:$0xff]  }
  0x67   :  { %1290 = vmatpush2.bf16.msra.mxu1 %v1891_v44  ;;  %1321 = vmatpush1.bf16.msra.mxu0 %v1886_v45  ;;  %v1963_v44 = vld [vmem:[#allocation7 + $0x33c] ss:$24 sps:$4 sm:$0xff]  }
  0x68   :  { %1291 = vmatprep.subr.bf16.mxu1 %v1895_v46  ;;  %1322 = vmatprep.subr.bf16.mxu0 %v1894_v48  ;;  %v1960_v45 = vld [vmem:[#allocation7 + $0x3c] ss:$24 sps:$4 sm:$0xff]   ;;  %v1961_v46 = vld [vmem:[#allocation7 + $0x338] ss:$24 sps:$4 sm:$0xff]   ;;  %v1969_v48 = vld [vmem:[#allocation7 + $0x30c] ss:$24 sps:$4 sm:$0xff]  }
  0x6b   :  { %1292 = vmatpush2.bf16.msra.mxu1 %v1897_v49  ;;  %1323 = vmatpush1.bf16.msra.mxu0 %v1892_v53  ;;  %v1966_v49 = vld [vmem:[#allocation7 + $0xc] ss:$24 sps:$4 sm:$0xff]   ;;  %v1972_v53 = vld [vmem:[#allocation7 + $0x2dc] ss:$24 sps:$4 sm:$0xff]  }
  0x6c   :  { %1293 = vmatprep.subr.bf16.mxu1 %v1901_v54  ;;  %1324 = vmatprep.subr.bf16.mxu0 %v1900_v55  ;;  %v1973_v54 = vld [vmem:[#allocation7 + $0x4e8] ss:$24 sps:$4 sm:$0xff]   ;;  %v1970_v55 = vld [vmem:[#allocation7 + $0x2d8] ss:$24 sps:$4 sm:$0xff]  }
  0x6f   :  { %1294 = vmatpush2.bf16.msra.mxu1 %v1903_v56  ;;  %1325 = vmatpush1.bf16.msra.mxu0 %v1898_v59  ;;  %v1981_v56 = vld [vmem:[#allocation7 + $0x4bc] ss:$24 sps:$4 sm:$0xff]   ;;  %v1979_v59 = vld [vmem:[#allocation7 + $0x4b8] ss:$24 sps:$4 sm:$0xff]  }
  0x70   :  { %1295 = vmatprep.subr.bf16.mxu1 %v1907_v60  ;;  %1336 = vmatprep.subr.bf16.mxu0 %v1906_v61  ;;  %v1976_v60 = vld [vmem:[#allocation7 + $0x2a8] ss:$24 sps:$4 sm:$0xff]   ;;  %v1987_v61 = vld [vmem:[#allocation7 + $0x48c] ss:$24 sps:$4 sm:$0xff]  }
  0x73   :  { %1296 = vmatpush2.bf16.msra.mxu1 %v1909_v62  ;;  %1337 = vmatpush2.bf16.msra.mxu0 %v1904_v1  ;;  %v1984_v62 = vld [vmem:[#allocation7 + $0x27c] ss:$24 sps:$4 sm:$0xff]   ;;  %v1985_v1 = vld [vmem:[#allocation7 + $0x488] ss:$24 sps:$4 sm:$0xff]  }
  0x74   :  { %1297 = vmatprep.subr.bf16.mxu1 %v1913_v2  ;;  %1338 = vmatprep.subr.bf16.mxu0 %v1912_v3  ;;  %v1982_v2 = vld [vmem:[#allocation7 + $0x278] ss:$24 sps:$4 sm:$0xff]   ;;  %v1993_v3 = vld [vmem:[#allocation7 + $0x164] ss:$24 sps:$4 sm:$0xff]  }
  0x77   :  { %1298 = vmatpush2.bf16.msra.mxu1 %v1915_v5  ;;  %1339 = vmatpush2.bf16.msra.mxu0 %v1910_v8  ;;  %v1991_v5 = vld [vmem:[#allocation7 + $0x160] ss:$24 sps:$4 sm:$0xff]   ;;  %v1996_v8 = vld [vmem:[#allocation7 + $0x21c] ss:$24 sps:$4 sm:$0xff]  }
  0x78   :  { %1299 = vmatprep.subr.bf16.mxu1 %v1919_v9  ;;  %1340 = vmatprep.subr.bf16.mxu0 %v1918_v10  ;;  %v1997_v9 = vld [vmem:[#allocation7 + $0x130] ss:$24 sps:$4 sm:$0xff]  }
  0x79   :  { %v1994_v10 = vld [vmem:[#allocation7 + $0x218] ss:$24 sps:$4 sm:$0xff]  }
  0x7b   :  { %1300 = vmatpush2.bf16.msra.mxu1 %v1921_v13  ;;  %1341 = vmatpush2.bf16.msra.mxu0 %v1916_v16  ;;  %v2003_v13 = vld [vmem:[#allocation7 + $0x100] ss:$24 sps:$4 sm:$0xff]   ;;  %v2011_v16 = vld [vmem:[#allocation7 + $0xd4] ss:$24 sps:$4 sm:$0xff]  }
  0x7c   :  { %1392 = vmatprep.subr.bf16.mxu1 %v1927_v17  ;;  %1351 = vmatprep.subr.bf16.mxu0 %v1924_v19  ;;  %v2008_v17 = vld [vmem:[#allocation7 + $0x1bc] ss:$24 sps:$4 sm:$0xff]   ;;  %v2009_v19 = vld [vmem:[#allocation7 + $0xd0] ss:$24 sps:$4 sm:$0xff]  }
  0x7e   :  { %1302 = vmatmul.mubr.bf16.vlgmr.msra.gmra.mxu1 %v2298_v20  ;;  %1343 = vmatmul.mubr.bf16.vlgmr.msra.gmra.mxu0 %v2302_v21 }
  0x7f   :  { %1393 = vmatpush1.bf16.msra.mxu1 %v1925_v22  ;;  %1352 = vmatpush1.bf16.msra.mxu0 %v1922_v23  ;;  %v2006_v22 = vld [vmem:[#allocation7 + $0x1b8] ss:$24 sps:$4 sm:$0xff]   ;;  %v2014_v23 = vld [vmem:[#allocation7 + $0x18c] ss:$24 sps:$4 sm:$0xff]  }
  0x80   :  { %1394 = vmatprep.subr.bf16.mxu1 %v1933_v24  ;;  %1353 = vmatprep.subr.bf16.mxu0 %v1930_v25  ;;  %v2015_v24 = vld [vmem:[#allocation7 + $0xa0] ss:$24 sps:$4 sm:$0xff]  }
  0x81   :  { %1819 = vmatprep.mubr.msk.bf16.mxu1 %vm1265_vm2, %v2295_v18  ;;  %1383 = vmatprep.mubr.bf16.mxu0 %v2293_v15  ;;  %v2012_v25 = vld [vmem:[#allocation7 + $0x188] ss:$24 sps:$4 sm:$0xff]  }
  0x83   :  { %1395 = vmatpush1.bf16.msra.mxu1 %v1931_v26  ;;  %1354 = vmatpush1.bf16.msra.mxu0 %v1928_v27  ;;  %v2023_v26 = vld [vmem:[#allocation7 + $0x74] ss:$24 sps:$4 sm:$0xff]   ;;  %v2020_v27 = vld [vmem:[#allocation7 + $0x464] ss:$24 sps:$4 sm:$0xff]  }
  0x84   :  { %1396 = vmatprep.subr.bf16.mxu1 %v1939_v28  ;;  %1355 = vmatprep.subr.bf16.mxu0 %v1936_v29  ;;  %v2021_v28 = vld [vmem:[#allocation7 + $0x70] ss:$24 sps:$4 sm:$0xff]   ;;  %v2018_v29 = vld [vmem:[#allocation7 + $0x460] ss:$24 sps:$4 sm:$0xff]  }
  0x87   :  { %1397 = vmatpush1.bf16.msra.mxu1 %v1937_v30  ;;  %1356 = vmatpush1.bf16.msra.mxu0 %v1934_v31  ;;  %v2029_v30 = vld [vmem:[#allocation7 + $0x44] ss:$24 sps:$4 sm:$0xff]   ;;  %v2026_v31 = vld [vmem:[#allocation7 + $0x434] ss:$24 sps:$4 sm:$0xff]  }
  0x88   :  { %1398 = vmatprep.subr.bf16.mxu1 %v1945_v32  ;;  %1357 = vmatprep.subr.bf16.mxu0 %v1942_v33  ;;  %v2027_v32 = vld [vmem:[#allocation7 + $0x40] ss:$24 sps:$4 sm:$0xff]   ;;  %v2024_v33 = vld [vmem:[#allocation7 + $0x430] ss:$24 sps:$4 sm:$0xff]  }
  0x8b   :  { %1399 = vmatpush1.bf16.msra.mxu1 %v1943_v34  ;;  %1358 = vmatpush1.bf16.msra.mxu0 %v1940_v35  ;;  %v2035_v34 = vld [vmem:[#allocation7 + $0x14] ss:$24 sps:$4 sm:$0xff]   ;;  %v2032_v35 = vld [vmem:[#allocation7 + $0x404] ss:$24 sps:$4 sm:$0xff]  }
  0x8c   :  { %1400 = vmatprep.subr.bf16.mxu1 %v1951_v36  ;;  %1359 = vmatprep.subr.bf16.mxu0 %v1948_v37  ;;  %v2033_v36 = vld [vmem:[#allocation7 + $0x10] ss:$24 sps:$4 sm:$0xff]   ;;  %v2030_v37 = vld [vmem:[#allocation7 + $0x400] ss:$24 sps:$4 sm:$0xff]  }
  0x8f   :  { %1401 = vmatpush1.bf16.msra.mxu1 %v1949_v38  ;;  %1360 = vmatpush1.bf16.msra.mxu0 %v1946_v39  ;;  %v2041_v38 = vld [vmem:[#allocation7 + $0x2e4] ss:$24 sps:$4 sm:$0xff]   ;;  %v2038_v39 = vld [vmem:[#allocation7 + $0x3d4] ss:$24 sps:$4 sm:$0xff]  }
  0x90   :  { %1402 = vmatprep.subr.bf16.mxu1 %v1957_v40  ;;  %1361 = vmatprep.subr.bf16.mxu0 %v1954_v41  ;;  %v2039_v40 = vld [vmem:[#allocation7 + $0x2e0] ss:$24 sps:$4 sm:$0xff]   ;;  %v2036_v41 = vld [vmem:[#allocation7 + $0x3d0] ss:$24 sps:$4 sm:$0xff]  }
  0x93   :  { %1403 = vmatpush1.bf16.msra.mxu1 %v1955_v42  ;;  %1362 = vmatpush1.bf16.msra.mxu0 %v1952_v43  ;;  %v2047_v42 = vld [vmem:[#allocation7 + $0x2b4] ss:$24 sps:$4 sm:$0xff]   ;;  %v2044_v43 = vld [vmem:[#allocation7 + $0x3a4] ss:$24 sps:$4 sm:$0xff]  }
  0x94   :  { %1404 = vmatprep.subr.bf16.mxu1 %v1963_v44  ;;  %1363 = vmatprep.subr.bf16.mxu0 %v1960_v45  ;;  %v2045_v44 = vld [vmem:[#allocation7 + $0x2b0] ss:$24 sps:$4 sm:$0xff]   ;;  %v2053_v45 = vld [vmem:[#allocation7 + $0x284] ss:$24 sps:$4 sm:$0xff]  }
  0x97   :  { %1405 = vmatpush1.bf16.msra.mxu1 %v1961_v46  ;;  %1364 = vmatpush1.bf16.msra.mxu0 %v1958_v47  ;;  %v2050_v46 = vld [vmem:[#allocation7 + $0x374] ss:$24 sps:$4 sm:$0xff]   ;;  %v2051_v47 = vld [vmem:[#allocation7 + $0x280] ss:$24 sps:$4 sm:$0xff]  }
  0x98   :  { %1406 = vmatprep.subr.bf16.mxu1 %v1969_v48  ;;  %1365 = vmatprep.subr.bf16.mxu0 %v1966_v49  ;;  %v2048_v48 = vld [vmem:[#allocation7 + $0x370] ss:$24 sps:$4 sm:$0xff]   ;;  %v2059_v49 = vld [vmem:[#allocation7 + $0x254] ss:$24 sps:$4 sm:$0xff]  }
  0x9b   :  { %1407 = vmatpush1.bf16.msra.mxu1 %v1967_v50  ;;  %1366 = vmatpush1.bf16.msra.mxu0 %v1964_v51  ;;  %v2056_v50 = vld [vmem:[#allocation7 + $0x344] ss:$24 sps:$4 sm:$0xff]   ;;  %v2057_v51 = vld [vmem:[#allocation7 + $0x250] ss:$24 sps:$4 sm:$0xff]  }
  0x9c   :  { %1418 = vmatprep.subr.bf16.mxu1 %v1975_v52  ;;  %1367 = vmatprep.subr.bf16.mxu0 %v1972_v53  ;;  %v2054_v52 = vld [vmem:[#allocation7 + $0x340] ss:$24 sps:$4 sm:$0xff]   ;;  %v2065_v53 = vld [vmem:[#allocation7 + $0x224] ss:$24 sps:$4 sm:$0xff]  }
  0x9f   :  { %1419 = vmatpush2.bf16.msra.mxu1 %v1973_v54  ;;  %1368 = vmatpush2.bf16.msra.mxu0 %v1970_v55  ;;  %v2062_v54 = vld [vmem:[#allocation7 + $0x314] ss:$24 sps:$4 sm:$0xff]   ;;  %v2063_v55 = vld [vmem:[#allocation7 + $0x220] ss:$24 sps:$4 sm:$0xff]  }
  0xa0   :  { %1420 = vmatprep.subr.bf16.mxu1 %v1981_v56  ;;  %1369 = vmatprep.subr.bf16.mxu0 %v1978_v57  ;;  %v2060_v56 = vld [vmem:[#allocation7 + $0x310] ss:$24 sps:$4 sm:$0xff]   ;;  %v2071_v57 = vld [vmem:[#allocation7 + $0x1f4] ss:$24 sps:$4 sm:$0xff]  }
  0xa3   :  { %1421 = vmatpush2.bf16.msra.mxu1 %v1979_v59  ;;  %1370 = vmatpush2.bf16.msra.mxu0 %v1976_v60  ;;  %v2068_v59 = vld [vmem:[#allocation7 + $0x4f4] ss:$24 sps:$4 sm:$0xff]   ;;  %v2069_v60 = vld [vmem:[#allocation7 + $0x1f0] ss:$24 sps:$4 sm:$0xff]  }
  0xa4   :  { %1422 = vmatprep.subr.bf16.mxu1 %v1987_v61  ;;  %1371 = vmatprep.subr.bf16.mxu0 %v1984_v62  ;;  %v2066_v61 = vld [vmem:[#allocation7 + $0x4f0] ss:$24 sps:$4 sm:$0xff]   ;;  %v2077_v62 = vld [vmem:[#allocation7 + $0x1c4] ss:$24 sps:$4 sm:$0xff]  }
  0xa7   :  { %1423 = vmatpush2.bf16.msra.mxu1 %v1985_v1  ;;  %1372 = vmatpush2.bf16.msra.mxu0 %v1982_v2  ;;  %v2074_v1 = vld [vmem:[#allocation7 + $0x4c4] ss:$24 sps:$4 sm:$0xff]   ;;  %v2075_v2 = vld [vmem:[#allocation7 + $0x1c0] ss:$24 sps:$4 sm:$0xff]  }
  0xa8   :  { %1433 = vmatprep.subr.bf16.mxu1 %v1993_v3  ;;  %1373 = vmatprep.subr.bf16.mxu0 %v1990_v4  ;;  %v2072_v3 = vld [vmem:[#allocation7 + $0x4c0] ss:$24 sps:$4 sm:$0xff]   ;;  %v2083_v4 = vld [vmem:[#allocation7 + $0x194] ss:$24 sps:$4 sm:$0xff]  }
  0xaa   :  { %1425 = vmatmul.mubr.bf16.vlgmr.msra.gmra.mxu1 %v2302_v21 }
  0xab   :  { %1434 = vmatpush1.bf16.msra.mxu1 %v1991_v5  ;;  %1465 = vmatprep.mubr.bf16.mxu1 %v2293_v15  ;;  %v2017_v15 = vld [vmem:[#allocation7 + $0xa4] ss:$24 sps:$4 sm:$0xff]   ;;  %v2080_v5 = vld [vmem:[#allocation7 + $0x494] ss:$24 sps:$4 sm:$0xff]  }
  0xac   :  { %1374 = vmatpush2.bf16.msra.mxu0 %v1988_v6  ;;  %1435 = vmatprep.subr.bf16.mxu1 %v1999_v7  ;;  %v2081_v6 = vld [vmem:[#allocation7 + $0x190] ss:$24 sps:$4 sm:$0xff]  }
  0xad   :  { %1375 = vmatprep.subr.bf16.mxu0 %v1996_v8  ;;  %v2078_v7 = vld [vmem:[#allocation7 + $0x490] ss:$24 sps:$4 sm:$0xff]  }
  0xaf   :  { %1436 = vmatpush1.bf16.msra.mxu1 %v1997_v9 }
  0xb0   :  { %1376 = vmatpush2.bf16.msra.mxu0 %v1994_v10  ;;  %1437 = vmatprep.subr.bf16.mxu1 %v2005_v11 }
  0xb1   :  { %1377 = vmatprep.subr.bf16.mxu0 %v2002_v12 }
  0xb3   :  { %1438 = vmatpush1.bf16.msra.mxu1 %v2003_v13 }
  0xb4   :  { %1378 = vmatpush2.bf16.msra.mxu0 %v2000_v14  ;;  %1439 = vmatprep.subr.bf16.mxu1 %v2011_v16 }
  0xb5   :  { %1379 = vmatprep.subr.bf16.mxu0 %v2008_v17 }
  0xb7   :  { %1440 = vmatpush1.bf16.msra.mxu1 %v2009_v19 }
  0xb8   :  { %1380 = vmatpush2.bf16.msra.mxu0 %v2006_v22  ;;  %1441 = vmatprep.subr.bf16.mxu1 %v2017_v15 }
  0xb9   :  { %1381 = vmatprep.subr.bf16.mxu0 %v2014_v23  ;;  %v1553_v23 = vld [vmem:[#allocation10] sm:$0x3f] }
  0xba   :  { %vm1554_vm3 = vcmp.gt.f32.partialorder %v1553_v23, 0.5 }
  0xbb   :  { %1442 = vmatpush1.bf16.msra.mxu1 %v2015_v24  ;;  %v2327_v24 = vld [vmem:[%s2357_s4] sm:$0x3f]  ;;  %s2223_s4 = smov [#allocation11]  }
  0xbc   :  { %1382 = vmatpush2.bf16.msra.mxu0 %v2012_v25  ;;  %1443 = vmatprep.subr.bf16.mxu1 %v2023_v26  ;;  %v1523_v25 = vsub.s32 1, %v2286_v58  ;;  %s1633_s21 = sshll.u32 %s2223_s4, 4  ;;  %s1634_s21 = int_to_ptr.vmem [resolvable:$true] %s1633_s21 }
  0xbd   :  { %1474 = vmatprep.subr.bf16.mxu0 %v2020_v27  ;;  %s2186_s22 = scalar_lea.vmem %s1634_s21, 192  ;;  %p2191_p12 = scmp.lt.s32.totalorder %s1634_s21, %s1634_s21 }
  0xbe   :  { %p2187_p11 = scmp.ne.s32.totalorder %s1634_s21, %s2186_s22  ;;  %p2192_p13 = scmp.lt.s32.totalorder %s2186_s22, %s2186_s22 }
  0xbf   :  { %1384 = vmatmul.mubr.bf16.vlgmr.msra.gmra.mxu0 %v2298_v20  ;;  %1444 = vmatpush1.bf16.msra.mxu1 %v2021_v28 }
  0xc0   :  { %1475 = vmatpush1.bf16.msra.mxu0 %v2018_v29  ;;  %1445 = vmatprep.subr.bf16.mxu1 %v2029_v30  ;;  %p2193_p0 = por %p2192_p13, %p2191_p12 }
  0xc1   :  { %1476 = vmatprep.subr.bf16.mxu0 %v2026_v31  ;;  %1820 = vmatprep.mubr.msk.bf16.mxu0 %vm1265_vm2, %v2295_v18  ;;  %v2042_v18 = vld [vmem:[#allocation7 + $0x3a0] ss:$24 sps:$4 sm:$0xff]  }
  0xc2   :  { %p2194_p1 = pnand %p2193_p0, %p2187_p11 }
  0xc3   :  { %1446 = vmatpush1.bf16.msra.mxu1 %v2027_v32 }
  0xc4   :  { %1477 = vmatpush1.bf16.msra.mxu0 %v2024_v33  ;;  %1447 = vmatprep.subr.bf16.mxu1 %v2035_v34 }
  0xc5   :  { %1478 = vmatprep.subr.bf16.mxu0 %v2032_v35  ;;  %v1524_v35 = vrot.slane %v2327_v24, %v1523_v25 }
  0xc7   :  { %1448 = vmatpush1.bf16.msra.mxu1 %v2033_v36 }
  0xc8   :  { %1479 = vmatpush1.bf16.msra.mxu0 %v2030_v37  ;;  %1449 = vmatprep.subr.bf16.mxu1 %v2041_v38 }
  0xc9   :  { %1480 = vmatprep.subr.bf16.mxu0 %v2038_v39 }
  0xcb   :  { %1450 = vmatpush2.bf16.msra.mxu1 %v2039_v40 }
  0xcc   :  { %1481 = vmatpush1.bf16.msra.mxu0 %v2036_v41  ;;  %1451 = vmatprep.subr.bf16.mxu1 %v2047_v42 }
  0xcd   :  { %1482 = vmatprep.subr.bf16.mxu0 %v2044_v43 }
  0xcf   :  { %1452 = vmatpush2.bf16.msra.mxu1 %v2045_v44 }
  0xd0   :  { %1483 = vmatpush1.bf16.msra.mxu0 %v2042_v18  ;;  %1453 = vmatprep.subr.bf16.mxu1 %v2053_v45 }
  0xd1   :  { %1484 = vmatprep.subr.bf16.mxu0 %v2050_v46 }
  0xd3   :  { %1454 = vmatpush2.bf16.msra.mxu1 %v2051_v47 }
  0xd4   :  { %1485 = vmatpush1.bf16.msra.mxu0 %v2048_v48  ;;  %1455 = vmatprep.subr.bf16.mxu1 %v2059_v49  ;;  %v1527_v49 = vsub.s32 2, %v2286_v58 }
  0xd5   :  { %1486 = vmatprep.subr.bf16.mxu0 %v2056_v50  ;;  %v1531_v50 = vsub.s32 3, %v2286_v58 }
  0xd7   :  { %1456 = vmatpush2.bf16.msra.mxu1 %v2057_v51 }
  0xd8   :  { %1487 = vmatpush1.bf16.msra.mxu0 %v2054_v52  ;;  %1457 = vmatprep.subr.bf16.mxu1 %v2065_v53  ;;  %v1528_v53 = vrot.slane %v2327_v24, %v1527_v49 }
  0xd9   :  { %1488 = vmatprep.subr.bf16.mxu0 %v2062_v54 }
  0xdb   :  { %1458 = vmatpush2.bf16.msra.mxu1 %v2063_v55 }
  0xdc   :  { %1489 = vmatpush1.bf16.msra.mxu0 %v2060_v56  ;;  %1459 = vmatprep.subr.bf16.mxu1 %v2071_v57 }
  0xdd   :  { %1500 = vmatprep.subr.bf16.mxu0 %v2068_v59 }
  0xdf   :  { %1460 = vmatpush2.bf16.msra.mxu1 %v2069_v60  ;;  %v1532_v60 = vrot.slane %v2327_v24, %v1531_v50 }
  0xe0   :  { %1501 = vmatpush2.bf16.msra.mxu0 %v2066_v61  ;;  %1461 = vmatprep.subr.bf16.mxu1 %v2077_v62 }
  0xe1   :  { %1502 = vmatprep.subr.bf16.mxu0 %v2074_v1 }
  0xe3   :  { %1462 = vmatpush2.bf16.msra.mxu1 %v2075_v2 }
  0xe4   :  { %1503 = vmatpush2.bf16.msra.mxu0 %v2072_v3  ;;  %1463 = vmatprep.subr.bf16.mxu1 %v2083_v4 }
  0xe5   :  { %1504 = vmatprep.subr.bf16.mxu0 %v2080_v5 }
  0xe7   :  { %1464 = vmatpush2.bf16.msra.mxu1 %v2081_v6 }
  0xe8   :  { %1505 = vmatpush2.bf16.msra.mxu0 %v2078_v7 }
  0xea   :  { %1466 = vmatmul.mubr.bf16.vlgmr.msra.gmra.mxu1 %v2298_v20  ;;  %v1519_v20 = vsub.s32 0, %v2286_v58 }
  0xeb   :  { %1507 = vmatmul.mubr.bf16.vlgmr.msra.gmra.mxu0 %v2302_v21  ;;  %v2322_v21 = vsel %vm1554_vm3, 1, %v2221_v0 }
  0xec   :  { %v1559_v27 = vrot.slane %v2322_v21, %v1519_v20  ;;  %v1520_v30 = vrot.slane %v2327_v24, %v1519_v20  ;;  %v1563_v32 = vrot.slane %v2322_v21, %v1523_v25  ;;  %v1567_v54 = vrot.slane %v2322_v21, %v1527_v49 }
  0xed   :  { %v1571_v56 = vrot.slane %v2322_v21, %v1531_v50 }
  0xee   :  { %vm1580_vm4 = vcmp.eq.s32.totalorder %v1559_v27, 1  ;;  %vm1581_vm5 = vcmp.eq.s32.totalorder %v1563_v32, 1  ;;  %vm1582_vm6 = vcmp.eq.s32.totalorder %v1567_v54, 1 }
  0xef   :  { %vm1583_vm7 = vcmp.eq.s32.totalorder %v1571_v56, 1 }
 0x102   :  { %v366_v8 = vpop.f32.mrf.mxu0 }
 0x104   :  { %v368_v9 = vpop.f32.mrf.mxu0 }
 0x106   :  { %v370_v10 = vpop.f32.mrf.mxu0 }
 0x107   :  { %v1535_v10 = vsub.s32 4, %v2286_v58 }
 0x108   :  { %v371_v11 = vpop.f32.mrf.mxu0 }
 0x109   :  { %v1539_v11 = vsub.s32 5, %v2286_v58 }
 0x10a   :  { %v407_v12 = vpop.f32.mrf.mxu0 }
 0x10b   :  { %v1579_v23 = vrot.slane %v2322_v21, %v1539_v11 }
 0x10c   :  { %v409_v13 = vpop.f32.mrf.mxu0 }
 0x10d   :  { %vm1585_vm9 = vcmp.eq.s32.totalorder %v1579_v23, 1 }
 0x10e   :  { %v411_v14 = vpop.f32.mrf.mxu0 }
 0x110   :  { %v412_v16 = vpop.f32.mrf.mxu0 }
 0x111   :  { %v1536_v16 = vrot.slane %v2327_v24, %v1535_v10 }
 0x112   :  { %v2316_v17 = vpop.f32.mrf.mxu0 }
 0x114   :  { %v2318_v19 = vpop.f32.mrf.mxu0 }
 0x116   :  { %v452_v22 = vpop.f32.mrf.mxu0 }
 0x118   :  { %v453_v15 = vpop.f32.mrf.mxu0 }
 0x119   :  { %v1575_v15 = vrot.slane %v2322_v21, %v1535_v10 }
 0x11b   :  { %vm1584_vm8 = vcmp.eq.s32.totalorder %v1575_v15, 1 }
 0x13e   :  { %v1303_v26 = vpop.f32.mrf.mxu1  ;;  %v1344_v28 = vpop.f32.mrf.mxu0 }
 0x13f   :  { %v1304_v29 = vadd.f32 %v1303_v26, %v366_v8  ;;  %v1540_v26 = vrot.slane %v2327_v24, %v1539_v11 }
 0x140   :  { %v1305_v31 = vpop.f32.mrf.mxu1  ;;  %v1346_v0 = vpop.f32.mrf.mxu0 }
 0x141   :  { %v1345_v33 = vadd.f32 %v1344_v28, %v1304_v29  ;;  %v1306_v34 = vadd.f32 %v1305_v31, %v368_v9 }
 0x142   :  { %v1307_v36 = vpop.f32.mrf.mxu1  ;;  %v1348_v39 = vpop.f32.mrf.mxu0 }
 0x143   :  { %v1547_v37 = vadd.f32 %v1520_v30, %v1345_v33  ;;  %v1347_v38 = vadd.f32 %v1346_v0, %v1306_v34 }
 0x144   :  { %v1308_v40 = vpop.f32.mrf.mxu1  ;;  %v1349_v43 = vpop.f32.mrf.mxu0 }
 0x145   :  { %v1586_v41 = vsel %vm1580_vm4, %v1547_v37, -1000000.0  ;;  %v1548_v42 = vadd.f32 %v1524_v35, %v1347_v38 }
 0x147   :  { %v1587_v44 = vsel %vm1581_vm5, %v1548_v42, -1000000.0 }
 0x148   :  { %v1598_v18 = vcombine.low %v1586_v41, %v1587_v44 }
 0x14a   :  { %v1606_v7 = vrot.slane %v1598_v18, %v2289_v63 }
 0x16a   :  { %v1426_v45 = vpop.f32.mrf.mxu1 }
 0x16c   :  { %v1428_v46 = vpop.f32.mrf.mxu1 }
 0x16e   :  { %v1430_v47 = vpop.f32.mrf.mxu1 }
 0x170   :  { %v1431_v48 = vpop.f32.mrf.mxu1 }
 0x17f   :  { %v1385_v51 = vpop.f32.mrf.mxu0 }
 0x180   :  { %v1386_v52 = vadd.f32 %v1385_v51, %v407_v12 }
 0x181   :  { %v1387_v55 = vpop.f32.mrf.mxu0 }
 0x182   :  { %v1427_v57 = vadd.f32 %v1426_v45, %v1386_v52  ;;  %v1388_v59 = vadd.f32 %v1387_v55, %v409_v13 }
 0x183   :  { %v1389_v61 = vpop.f32.mrf.mxu0 }
 0x184   :  { %v1549_v62 = vadd.f32 %v1528_v53, %v1427_v57  ;;  %v1429_v1 = vadd.f32 %v1428_v46, %v1388_v59 }
 0x185   :  { %v1390_v2 = vpop.f32.mrf.mxu0 }
 0x186   :  { %v1550_v3 = vadd.f32 %v1532_v60, %v1429_v1  ;;  %v1588_v4 = vsel %vm1582_vm6, %v1549_v62, -1000000.0 }
 0x188   :  { %v1589_v5 = vsel %vm1583_vm7, %v1550_v3, -1000000.0 }
 0x189   :  { %v1599_v6 = vcombine.low %v1588_v4, %v1589_v5 }
 0x18b   :  { %v1613_v8 = vrot.slane %v1599_v6, %v2289_v63 }
 0x18d   :  { %v1614_v9 = vcombine.low %v1606_v7, %v1613_v8 }
 0x18f   :  { %1625 = vst [vmem:[#allocation11] sm:$0xff] %v1614_v9 }
 0x1aa   :  { %v1467_v12 = vpop.f32.mrf.mxu1 }
 0x1ab   :  { %v1508_v13 = vpop.f32.mrf.mxu0  ;;  %v1468_v14 = vadd.f32 %v1467_v12, %v2316_v17 }
 0x1ac   :  { %v1469_v22 = vpop.f32.mrf.mxu1 }
 0x1ad   :  { %v1509_v20 = vadd.f32 %v1508_v13, %v1468_v14  ;;  %v1510_v25 = vpop.f32.mrf.mxu0  ;;  %v1470_v63 = vadd.f32 %v1469_v22, %v2318_v19 }
 0x1ae   :  { %v1471_v27 = vpop.f32.mrf.mxu1 }
 0x1af   :  { %v1551_v28 = vadd.f32 %v1536_v16, %v1509_v20  ;;  %v1511_v58 = vadd.f32 %v1510_v25, %v1470_v63  ;;  %v1512_v29 = vpop.f32.mrf.mxu0 }
 0x1b0   :  { %v1472_v30 = vpop.f32.mrf.mxu1 }
 0x1b1   :  { %v1552_v17 = vadd.f32 %v1540_v26, %v1511_v58  ;;  %v1513_v31 = vpop.f32.mrf.mxu0  ;;  %v1590_v32 = vsel %vm1584_vm8, %v1551_v28, -1000000.0 }
 0x1b3   :  { %v1591_v33 = vsel %vm1585_vm9, %v1552_v17, -1000000.0 }
 0x1b4   :  { %v1615_v21 = vcombine.low %v1590_v32, %v1591_v33 }
 0x1b6   :  { %1821 = vst.sshfl [vmem:[#allocation11 + $0x8] sm:$0x33 pattern:$0x76325410] %v1615_v21 }
 0x1b7   :  { %2197 = shalt.err (!%p2194_p1)
}
 0x1b8   :  { %1636 = dma.vmem_to_hbm [thread:$0]  %s1634_s21, 192, %s2359_s6, [#allocation4]  }
 0x1b9   :  { %2212 = dma.done.wait [#allocation4], 192  }
 0x1ba   :  { %2213 = vsyncadd [#allocation4], 4294967104 }
 0x1bb   :  { %1640 = vsyncpa [#allocation3], 1 }
 0x1bc   :  { %1641 = vsyncpa [#allocation6], 1 }
 0x1bd   :  { %1642 = vsyncpa [#allocation9], 1 }
 0x1be   :  { %1643 = vsyncpa [#allocation4], 1 }

</bundles_post_ra>
